<compile_context>
chip_gen: v6e
topology: v6e:2x2x1
jax: 0.10.0
libtpu: 0.0.40
codegen_flags: <defaults>
</compile_context>

<pallas_src>
import functools

import jax
import jax.numpy as jnp
from jax import lax
from jax.experimental import pallas as pl
from jax.experimental.pallas import tpu as pltpu

MAX_DEC_LENGTH = 100
MAX_TYPE_NUM = 5


def _prev_pred_emb_kernel(inds_sm, inds_ref, ans_ref, ocr_ref, pos_ref, cst_ref,
                          out_ref, raw_ref, *, ln_eps, ans_num):
    """One batch element per grid step.

    inds_sm : SMEM (B, S_pad) int32       scalar-prefetched prev_inds (addressing)
    inds_ref: VMEM (S_pad, 1) int32       vector copy (lane-broadcast compare)
    ans_ref : VMEM (A, H)                 raw answer table (shared, single-buffered)
    ocr_ref : VMEM (O, H)                 raw OCR rows of this batch element
    pos_ref : VMEM (S_pad, H)             position-embedding slice (shared)
    cst_ref : VMEM (8, H)                 [ans_g, ans_b, ocr_g, ocr_b, emb_g, emb_b, t0, t1]
    out_ref : VMEM (S_pad, H)             output block
    raw_ref : VMEM (S_pad, H) f32 scratch gathered raw rows
    """
    f32 = jnp.float32
    b = pl.program_id(0)
    seq = raw_ref.shape[0]
    a_num = ans_ref.shape[0]
    o_num = ocr_ref.shape[0]

    # ---- Gather: dynamic row loads addressed by SMEM scalars (no MXU, no
    # one-hot temps).  Indices are clamped, matching jnp.take_along_axis.
    def gather_row(s, carry):
        idx = inds_sm[b, s]
        ia = jnp.clip(idx, 0, a_num - 1)
        io = jnp.clip(idx - ans_num, 0, o_num - 1)
        row_a = ans_ref[pl.ds(ia, 1), :].astype(f32)        # (1, H)
        row_o = ocr_ref[pl.ds(io, 1), :].astype(f32)        # (1, H)
        raw_ref[pl.ds(s, 1), :] = jnp.where(idx >= ans_num, row_o, row_a)
        return carry

    lax.fori_loop(0, seq, gather_row, 0, unroll=(seq <= 32))

    # ---- Vectorized LayerNorms / selects over the S gathered rows only.
    def ln_core(x):
        mu = jnp.mean(x, axis=-1, keepdims=True)
        xc = x - mu
        var = jnp.mean(xc * xc, axis=-1, keepdims=True)
        return xc * lax.rsqrt(var + ln_eps)

    cst = cst_ref[...].astype(f32)                          # (8, H)
    is_ocr = inds_ref[...] >= ans_num                       # (S_pad, 1) == token_type_ids

    g_row = jnp.where(is_ocr, cst[2:3], cst[0:1])           # (S_pad, H)
    b_row = jnp.where(is_ocr, cst[3:4], cst[1:2])
    raw_dec = ln_core(raw_ref[...]) * g_row + b_row         # LN-after-gather == gather-of-LN

    # Token-type embedding: type id is 0 or 1 -> plain VPU select.
    type_emb = jnp.where(is_ocr, cst[7:8], cst[6:7])        # (S_pad, H)
    # (If this branch ever becomes the bottleneck it is batch-invariant up to a
    #  2-way select and could be hoisted; the gather dominates, so keep it here.)
    emb = pos_ref[...].astype(f32) + type_emb
    emb = ln_core(emb) * cst[4:5] + cst[5:6]
    # TODO(synk): emb_dropout is identity in eval mode; training-mode dropout not implemented.

    out_ref[...] = (raw_dec + emb).astype(out_ref.dtype)


def _single_buffered_spec(block_shape, index_map):
    """Constant-index-map operands never change across the grid -> 1 buffer."""
    try:
        return pl.BlockSpec(block_shape, index_map, pipeline_mode=pl.Buffered(1))
    except (AttributeError, TypeError):        # older jax: fall back to default buffering
        return pl.BlockSpec(block_shape, index_map)


def prev_pred_embeddings(ans_emb, ocr_emb, prev_inds, params, ln_eps=1e-12):
    """Pallas-backed PrevPredEmbeddings.forward (eval mode)."""
    B, S = prev_inds.shape
    A, H = ans_emb.shape
    O = ocr_emb.shape[1]

    # Pad the sequence dim to a sublane multiple; cropped after the call.
    # TODO(synk): if production H is not a 128 multiple, also pad H for lane-dense stores.
    S_pad = -(-S // 8) * 8

    inds = prev_inds.astype(jnp.int32)
    pos = params["pos_table"][:S].astype(jnp.float32)       # glue: static slice
    if S_pad != S:
        inds = jnp.pad(inds, ((0, 0), (0, S_pad - S)))
        pos = jnp.pad(pos, ((0, S_pad - S), (0, 0)))
    inds_col = inds[..., None]                               # (B, S_pad, 1) vector copy

    # Pack the six LN (gamma, beta) rows plus the two live token-type rows into
    # one sublane-aligned (8, H) operand.
    const = jnp.stack(
        [params["ans_g"], params["ans_b"],
         params["ocr_g"], params["ocr_b"],
         params["emb_g"], params["emb_b"],
         params["type_table"][0], params["type_table"][1]],
        axis=0,
    ).astype(jnp.float32)                                    # (8, H)

    # VMEM budget: single-buffered constants + double-buffered per-batch blocks
    # + scratch + LN temporaries, with headroom; capped at 48 MiB (< v7x 64 MiB).
    itemsize = 4
    resident = (A * H + S_pad * H + 8 * H) * itemsize            # single-buffered constants
    streamed = 2 * (O * H + S_pad * H + S_pad) * itemsize        # double-buffered per-batch blocks
    scratch_temps = 7 * S_pad * H * itemsize                     # raw scratch + LN temporaries
    vmem_limit = int(min(max(resident + streamed + scratch_temps + (4 << 20),
                             16 << 20),
                         48 << 20))

    kernel = functools.partial(_prev_pred_emb_kernel, ln_eps=ln_eps, ans_num=A)

    grid_spec = pltpu.PrefetchScalarGridSpec(
        num_scalar_prefetch=1,               # prev_inds -> SMEM, drives the row gather
        grid=(B,),
        in_specs=[
            pl.BlockSpec((None, S_pad, 1), lambda b, _i: (b, 0, 0)),     # inds vector copy
            _single_buffered_spec((A, H), lambda b, _i: (0, 0)),         # raw ans table (shared)
            pl.BlockSpec((None, O, H), lambda b, _i: (b, 0, 0)),         # raw ocr rows [b]
            _single_buffered_spec((S_pad, H), lambda b, _i: (0, 0)),     # position slice (shared)
            _single_buffered_spec((8, H), lambda b, _i: (0, 0)),         # LN params + type rows
        ],
        out_specs=pl.BlockSpec((None, S_pad, H), lambda b, _i: (b, 0, 0)),
        scratch_shapes=[pltpu.VMEM((S_pad, H), jnp.float32)],
    )

    out = pl.pallas_call(
        kernel,
        out_shape=jax.ShapeDtypeStruct((B, S_pad, H), jnp.float32),
        grid_spec=grid_spec,
        compiler_params=pltpu.CompilerParams(
            dimension_semantics=("parallel",),
            vmem_limit_bytes=vmem_limit,
        ),
    )(inds, inds_col, ans_emb.astype(jnp.float32), ocr_emb.astype(jnp.float32),
      pos, const)

    return out[:, :S] if S_pad != S else out


def _reference(ans_emb, ocr_emb, prev_inds, params, ln_eps=1e-12):
    """Pure-JAX reference mirroring the PyTorch forward (eval mode)."""
    def ln(x, g, b):
        mu = jnp.mean(x, axis=-1, keepdims=True)
        var = jnp.mean((x - mu) ** 2, axis=-1, keepdims=True)
        return (x - mu) / jnp.sqrt(var + ln_eps) * g + b

    B, S = prev_inds.shape
    A = ans_emb.shape[0]
    ans = ln(ans_emb, params["ans_g"], params["ans_b"])
    ocr = ln(ocr_emb, params["ocr_g"], params["ocr_b"])
    cat = jnp.concatenate([jnp.broadcast_to(ans[None], (B,) + ans.shape), ocr], axis=1)
    raw = jnp.take_along_axis(cat, prev_inds[..., None].astype(jnp.int32), axis=1)
    pos = params["pos_table"][:S][None].repeat(B, axis=0)
    tt = (prev_inds >= A).astype(jnp.int32)
    typ = params["type_table"][tt]
    emb = ln(pos + typ, params["emb_g"], params["emb_b"])
    return raw + emb


if __name__ == "__main__":
    B, S, H = 2, 8, 32
    A, O = 16, 8

    key = jax.random.PRNGKey(0)
    keys = jax.random.split(key, 10)

    ans_emb = jax.random.normal(keys[0], (A, H), dtype=jnp.float32)
    ocr_emb = jax.random.normal(keys[1], (B, O, H), dtype=jnp.float32)
    prev_inds = jax.random.randint(keys[2], (B, S), 0, A + O, dtype=jnp.int32)

    params = {
        "pos_table": jax.random.normal(keys[3], (MAX_DEC_LENGTH, H), dtype=jnp.float32) * 0.02,
        "type_table": jax.random.normal(keys[4], (MAX_TYPE_NUM, H), dtype=jnp.float32) * 0.02,
        "ans_g": 1.0 + 0.1 * jax.random.normal(keys[5], (H,), dtype=jnp.float32),
        "ans_b": 0.1 * jax.random.normal(keys[6], (H,), dtype=jnp.float32),
        "ocr_g": 1.0 + 0.1 * jax.random.normal(keys[7], (H,), dtype=jnp.float32),
        "ocr_b": 0.1 * jax.random.normal(keys[8], (H,), dtype=jnp.float32),
        "emb_g": jnp.ones((H,), dtype=jnp.float32),
        "emb_b": jnp.zeros((H,), dtype=jnp.float32),
    }

    out = prev_pred_embeddings(ans_emb, ocr_emb, prev_inds, params)
    out = jax.block_until_ready(out)

    ref = _reference(ans_emb, ocr_emb, prev_inds, params)
    assert out.shape == (B, S, H)
    assert jnp.allclose(out, ref, atol=1e-4, rtol=1e-4), "mismatch vs reference"

    print("KERNEL_OK")
</pallas_src>

<mosaic_0001>
module attributes {stable_mosaic.version = 11 : i64} {
  func.func @_prev_pred_emb_kernel(%arg0: i32, %arg1: memref<2x8xi32, #tpu.memory_space<smem>>, %arg2: memref<1x8x1xi32, #tpu.memory_space<vmem>>, %arg3: memref<16x32xf32, #tpu.memory_space<vmem>>, %arg4: memref<1x8x32xf32, #tpu.memory_space<vmem>>, %arg5: memref<8x32xf32, #tpu.memory_space<vmem>>, %arg6: memref<8x32xf32, #tpu.memory_space<vmem>>, %arg7: memref<1x8x32xf32, #tpu.memory_space<vmem>>, %arg8: memref<8x32xf32, #tpu.memory_space<vmem>>) attributes {dimension_semantics = [#tpu.dimension_semantics<parallel>], iteration_bounds = array<i64: 2>, scalar_prefetch = 1 : i64, scratch_operands = 1 : i64, tpu.core_type = #tpu.core_type<tc>, window_params = [{transform_indices = @transform_0, window_bounds = array<i64: 1, 8, 1>}, {pipeline_mode = #tpu.pipeline_mode<synchronous>, transform_indices = @transform_1, window_bounds = array<i64: 16, 32>}, {transform_indices = @transform_2, window_bounds = array<i64: 1, 8, 32>}, {pipeline_mode = #tpu.pipeline_mode<synchronous>, transform_indices = @transform_3, window_bounds = array<i64: 8, 32>}, {pipeline_mode = #tpu.pipeline_mode<synchronous>, transform_indices = @transform_4, window_bounds = array<i64: 8, 32>}, {transform_indices = @transform_5, window_bounds = array<i64: 1, 8, 32>}]} {
    %c0_i32 = arith.constant 0 : i32
    %0 = arith.index_cast %arg0 : i32 to index
    %1 = arith.index_cast %c0_i32 : i32 to index
    %2 = memref.load %arg1[%0, %1] : memref<2x8xi32, #tpu.memory_space<smem>>
    %c0_i32_0 = arith.constant 0 : i32
    %c15_i32 = arith.constant 15 : i32
    %3 = arith.maxsi %c0_i32_0, %2 : i32
    %4 = arith.minsi %c15_i32, %3 : i32
    %c16_i32 = arith.constant 16 : i32
    %5 = arith.subi %2, %c16_i32 : i32
    %c0_i32_1 = arith.constant 0 : i32
    %c7_i32 = arith.constant 7 : i32
    %6 = arith.maxsi %c0_i32_1, %5 : i32
    %7 = arith.minsi %c7_i32, %6 : i32
    %8 = arith.index_cast %4 : i32 to index
    %c0 = arith.constant 0 : index
    %9 = vector.load %arg3[%8, %c0] : memref<16x32xf32, #tpu.memory_space<vmem>>, vector<1x32xf32>
    %c0_2 = arith.constant 0 : index
    %10 = arith.index_cast %7 : i32 to index
    %c0_3 = arith.constant 0 : index
    %11 = vector.load %arg4[%c0_2, %10, %c0_3] : memref<1x8x32xf32, #tpu.memory_space<vmem>>, vector<1x1x32xf32>
    %12 = vector.shape_cast %11 : vector<1x1x32xf32> to vector<1x32xf32>
    %c16_i32_4 = arith.constant 16 : i32
    %13 = arith.cmpi sge, %2, %c16_i32_4 : i32
    %14 = arith.select %13, %12, %9 : vector<1x32xf32>
    %15 = arith.index_cast %c0_i32 : i32 to index
    %c0_5 = arith.constant 0 : index
    %16 = vector.load %arg8[%15, %c0_5] : memref<8x32xf32, #tpu.memory_space<vmem>>, vector<1x32xf32>
    tpu.vector_store %arg8[%15, %c0_5], %14 {strides = array<i32>} : memref<8x32xf32, #tpu.memory_space<vmem>>, vector<1x32xf32>,
    %c1_i32 = arith.constant 1 : i32
    %17 = arith.index_cast %arg0 : i32 to index
    %18 = arith.index_cast %c1_i32 : i32 to index
    %19 = memref.load %arg1[%17, %18] : memref<2x8xi32, #tpu.memory_space<smem>>
    %c0_i32_6 = arith.constant 0 : i32
    %c15_i32_7 = arith.constant 15 : i32
    %20 = arith.maxsi %c0_i32_6, %19 : i32
    %21 = arith.minsi %c15_i32_7, %20 : i32
    %c16_i32_8 = arith.constant 16 : i32
    %22 = arith.subi %19, %c16_i32_8 : i32
    %c0_i32_9 = arith.constant 0 : i32
    %c7_i32_10 = arith.constant 7 : i32
    %23 = arith.maxsi %c0_i32_9, %22 : i32
    %24 = arith.minsi %c7_i32_10, %23 : i32
    %25 = arith.index_cast %21 : i32 to index
    %c0_11 = arith.constant 0 : index
    %26 = vector.load %arg3[%25, %c0_11] : memref<16x32xf32, #tpu.memory_space<vmem>>, vector<1x32xf32>
    %c0_12 = arith.constant 0 : index
    %27 = arith.index_cast %24 : i32 to index
    %c0_13 = arith.constant 0 : index
    %28 = vector.load %arg4[%c0_12, %27, %c0_13] : memref<1x8x32xf32, #tpu.memory_space<vmem>>, vector<1x1x32xf32>
    %29 = vector.shape_cast %28 : vector<1x1x32xf32> to vector<1x32xf32>
    %c16_i32_14 = arith.constant 16 : i32
    %30 = arith.cmpi sge, %19, %c16_i32_14 : i32
    %31 = arith.select %30, %29, %26 : vector<1x32xf32>
    %32 = arith.index_cast %c1_i32 : i32 to index
    %c0_15 = arith.constant 0 : index
    %33 = vector.load %arg8[%32, %c0_15] : memref<8x32xf32, #tpu.memory_space<vmem>>, vector<1x32xf32>
    tpu.vector_store %arg8[%32, %c0_15], %31 {strides = array<i32>} : memref<8x32xf32, #tpu.memory_space<vmem>>, vector<1x32xf32>,
    %c2_i32 = arith.constant 2 : i32
    %34 = arith.index_cast %arg0 : i32 to index
    %35 = arith.index_cast %c2_i32 : i32 to index
    %36 = memref.load %arg1[%34, %35] : memref<2x8xi32, #tpu.memory_space<smem>>
    %c0_i32_16 = arith.constant 0 : i32
    %c15_i32_17 = arith.constant 15 : i32
    %37 = arith.maxsi %c0_i32_16, %36 : i32
    %38 = arith.minsi %c15_i32_17, %37 : i32
    %c16_i32_18 = arith.constant 16 : i32
    %39 = arith.subi %36, %c16_i32_18 : i32
    %c0_i32_19 = arith.constant 0 : i32
    %c7_i32_20 = arith.constant 7 : i32
    %40 = arith.maxsi %c0_i32_19, %39 : i32
    %41 = arith.minsi %c7_i32_20, %40 : i32
    %42 = arith.index_cast %38 : i32 to index
    %c0_21 = arith.constant 0 : index
    %43 = vector.load %arg3[%42, %c0_21] : memref<16x32xf32, #tpu.memory_space<vmem>>, vector<1x32xf32>
    %c0_22 = arith.constant 0 : index
    %44 = arith.index_cast %41 : i32 to index
    %c0_23 = arith.constant 0 : index
    %45 = vector.load %arg4[%c0_22, %44, %c0_23] : memref<1x8x32xf32, #tpu.memory_space<vmem>>, vector<1x1x32xf32>
    %46 = vector.shape_cast %45 : vector<1x1x32xf32> to vector<1x32xf32>
    %c16_i32_24 = arith.constant 16 : i32
    %47 = arith.cmpi sge, %36, %c16_i32_24 : i32
    %48 = arith.select %47, %46, %43 : vector<1x32xf32>
    %49 = arith.index_cast %c2_i32 : i32 to index
    %c0_25 = arith.constant 0 : index
    %50 = vector.load %arg8[%49, %c0_25] : memref<8x32xf32, #tpu.memory_space<vmem>>, vector<1x32xf32>
    tpu.vector_store %arg8[%49, %c0_25], %48 {strides = array<i32>} : memref<8x32xf32, #tpu.memory_space<vmem>>, vector<1x32xf32>,
    %c3_i32 = arith.constant 3 : i32
    %51 = arith.index_cast %arg0 : i32 to index
    %52 = arith.index_cast %c3_i32 : i32 to index
    %53 = memref.load %arg1[%51, %52] : memref<2x8xi32, #tpu.memory_space<smem>>
    %c0_i32_26 = arith.constant 0 : i32
    %c15_i32_27 = arith.constant 15 : i32
    %54 = arith.maxsi %c0_i32_26, %53 : i32
    %55 = arith.minsi %c15_i32_27, %54 : i32
    %c16_i32_28 = arith.constant 16 : i32
    %56 = arith.subi %53, %c16_i32_28 : i32
    %c0_i32_29 = arith.constant 0 : i32
    %c7_i32_30 = arith.constant 7 : i32
    %57 = arith.maxsi %c0_i32_29, %56 : i32
    %58 = arith.minsi %c7_i32_30, %57 : i32
    %59 = arith.index_cast %55 : i32 to index
    %c0_31 = arith.constant 0 : index
    %60 = vector.load %arg3[%59, %c0_31] : memref<16x32xf32, #tpu.memory_space<vmem>>, vector<1x32xf32>
    %c0_32 = arith.constant 0 : index
    %61 = arith.index_cast %58 : i32 to index
    %c0_33 = arith.constant 0 : index
    %62 = vector.load %arg4[%c0_32, %61, %c0_33] : memref<1x8x32xf32, #tpu.memory_space<vmem>>, vector<1x1x32xf32>
    %63 = vector.shape_cast %62 : vector<1x1x32xf32> to vector<1x32xf32>
    %c16_i32_34 = arith.constant 16 : i32
    %64 = arith.cmpi sge, %53, %c16_i32_34 : i32
    %65 = arith.select %64, %63, %60 : vector<1x32xf32>
    %66 = arith.index_cast %c3_i32 : i32 to index
    %c0_35 = arith.constant 0 : index
    %67 = vector.load %arg8[%66, %c0_35] : memref<8x32xf32, #tpu.memory_space<vmem>>, vector<1x32xf32>
    tpu.vector_store %arg8[%66, %c0_35], %65 {strides = array<i32>} : memref<8x32xf32, #tpu.memory_space<vmem>>, vector<1x32xf32>,
    %c4_i32 = arith.constant 4 : i32
    %68 = arith.index_cast %arg0 : i32 to index
    %69 = arith.index_cast %c4_i32 : i32 to index
    %70 = memref.load %arg1[%68, %69] : memref<2x8xi32, #tpu.memory_space<smem>>
    %c0_i32_36 = arith.constant 0 : i32
    %c15_i32_37 = arith.constant 15 : i32
    %71 = arith.maxsi %c0_i32_36, %70 : i32
    %72 = arith.minsi %c15_i32_37, %71 : i32
    %c16_i32_38 = arith.constant 16 : i32
    %73 = arith.subi %70, %c16_i32_38 : i32
    %c0_i32_39 = arith.constant 0 : i32
    %c7_i32_40 = arith.constant 7 : i32
    %74 = arith.maxsi %c0_i32_39, %73 : i32
    %75 = arith.minsi %c7_i32_40, %74 : i32
    %76 = arith.index_cast %72 : i32 to index
    %c0_41 = arith.constant 0 : index
    %77 = vector.load %arg3[%76, %c0_41] : memref<16x32xf32, #tpu.memory_space<vmem>>, vector<1x32xf32>
    %c0_42 = arith.constant 0 : index
    %78 = arith.index_cast %75 : i32 to index
    %c0_43 = arith.constant 0 : index
    %79 = vector.load %arg4[%c0_42, %78, %c0_43] : memref<1x8x32xf32, #tpu.memory_space<vmem>>, vector<1x1x32xf32>
    %80 = vector.shape_cast %79 : vector<1x1x32xf32> to vector<1x32xf32>
    %c16_i32_44 = arith.constant 16 : i32
    %81 = arith.cmpi sge, %70, %c16_i32_44 : i32
    %82 = arith.select %81, %80, %77 : vector<1x32xf32>
    %83 = arith.index_cast %c4_i32 : i32 to index
    %c0_45 = arith.constant 0 : index
    %84 = vector.load %arg8[%83, %c0_45] : memref<8x32xf32, #tpu.memory_space<vmem>>, vector<1x32xf32>
    tpu.vector_store %arg8[%83, %c0_45], %82 {strides = array<i32>} : memref<8x32xf32, #tpu.memory_space<vmem>>, vector<1x32xf32>,
    %c5_i32 = arith.constant 5 : i32
    %85 = arith.index_cast %arg0 : i32 to index
    %86 = arith.index_cast %c5_i32 : i32 to index
    %87 = memref.load %arg1[%85, %86] : memref<2x8xi32, #tpu.memory_space<smem>>
    %c0_i32_46 = arith.constant 0 : i32
    %c15_i32_47 = arith.constant 15 : i32
    %88 = arith.maxsi %c0_i32_46, %87 : i32
    %89 = arith.minsi %c15_i32_47, %88 : i32
    %c16_i32_48 = arith.constant 16 : i32
    %90 = arith.subi %87, %c16_i32_48 : i32
    %c0_i32_49 = arith.constant 0 : i32
    %c7_i32_50 = arith.constant 7 : i32
    %91 = arith.maxsi %c0_i32_49, %90 : i32
    %92 = arith.minsi %c7_i32_50, %91 : i32
    %93 = arith.index_cast %89 : i32 to index
    %c0_51 = arith.constant 0 : index
    %94 = vector.load %arg3[%93, %c0_51] : memref<16x32xf32, #tpu.memory_space<vmem>>, vector<1x32xf32>
    %c0_52 = arith.constant 0 : index
    %95 = arith.index_cast %92 : i32 to index
    %c0_53 = arith.constant 0 : index
    %96 = vector.load %arg4[%c0_52, %95, %c0_53] : memref<1x8x32xf32, #tpu.memory_space<vmem>>, vector<1x1x32xf32>
    %97 = vector.shape_cast %96 : vector<1x1x32xf32> to vector<1x32xf32>
    %c16_i32_54 = arith.constant 16 : i32
    %98 = arith.cmpi sge, %87, %c16_i32_54 : i32
    %99 = arith.select %98, %97, %94 : vector<1x32xf32>
    %100 = arith.index_cast %c5_i32 : i32 to index
    %c0_55 = arith.constant 0 : index
    %101 = vector.load %arg8[%100, %c0_55] : memref<8x32xf32, #tpu.memory_space<vmem>>, vector<1x32xf32>
    tpu.vector_store %arg8[%100, %c0_55], %99 {strides = array<i32>} : memref<8x32xf32, #tpu.memory_space<vmem>>, vector<1x32xf32>,
    %c6_i32 = arith.constant 6 : i32
    %102 = arith.index_cast %arg0 : i32 to index
    %103 = arith.index_cast %c6_i32 : i32 to index
    %104 = memref.load %arg1[%102, %103] : memref<2x8xi32, #tpu.memory_space<smem>>
    %c0_i32_56 = arith.constant 0 : i32
    %c15_i32_57 = arith.constant 15 : i32
    %105 = arith.maxsi %c0_i32_56, %104 : i32
    %106 = arith.minsi %c15_i32_57, %105 : i32
    %c16_i32_58 = arith.constant 16 : i32
    %107 = arith.subi %104, %c16_i32_58 : i32
    %c0_i32_59 = arith.constant 0 : i32
    %c7_i32_60 = arith.constant 7 : i32
    %108 = arith.maxsi %c0_i32_59, %107 : i32
    %109 = arith.minsi %c7_i32_60, %108 : i32
    %110 = arith.index_cast %106 : i32 to index
    %c0_61 = arith.constant 0 : index
    %111 = vector.load %arg3[%110, %c0_61] : memref<16x32xf32, #tpu.memory_space<vmem>>, vector<1x32xf32>
    %c0_62 = arith.constant 0 : index
    %112 = arith.index_cast %109 : i32 to index
    %c0_63 = arith.constant 0 : index
    %113 = vector.load %arg4[%c0_62, %112, %c0_63] : memref<1x8x32xf32, #tpu.memory_space<vmem>>, vector<1x1x32xf32>
    %114 = vector.shape_cast %113 : vector<1x1x32xf32> to vector<1x32xf32>
    %c16_i32_64 = arith.constant 16 : i32
    %115 = arith.cmpi sge, %104, %c16_i32_64 : i32
    %116 = arith.select %115, %114, %111 : vector<1x32xf32>
    %117 = arith.index_cast %c6_i32 : i32 to index
    %c0_65 = arith.constant 0 : index
    %118 = vector.load %arg8[%117, %c0_65] : memref<8x32xf32, #tpu.memory_space<vmem>>, vector<1x32xf32>
    tpu.vector_store %arg8[%117, %c0_65], %116 {strides = array<i32>} : memref<8x32xf32, #tpu.memory_space<vmem>>, vector<1x32xf32>,
    %c7_i32_66 = arith.constant 7 : i32
    %119 = arith.index_cast %arg0 : i32 to index
    %120 = arith.index_cast %c7_i32_66 : i32 to index
    %121 = memref.load %arg1[%119, %120] : memref<2x8xi32, #tpu.memory_space<smem>>
    %c0_i32_67 = arith.constant 0 : i32
    %c15_i32_68 = arith.constant 15 : i32
    %122 = arith.maxsi %c0_i32_67, %121 : i32
    %123 = arith.minsi %c15_i32_68, %122 : i32
    %c16_i32_69 = arith.constant 16 : i32
    %124 = arith.subi %121, %c16_i32_69 : i32
    %c0_i32_70 = arith.constant 0 : i32
    %c7_i32_71 = arith.constant 7 : i32
    %125 = arith.maxsi %c0_i32_70, %124 : i32
    %126 = arith.minsi %c7_i32_71, %125 : i32
    %127 = arith.index_cast %123 : i32 to index
    %c0_72 = arith.constant 0 : index
    %128 = vector.load %arg3[%127, %c0_72] : memref<16x32xf32, #tpu.memory_space<vmem>>, vector<1x32xf32>
    %c0_73 = arith.constant 0 : index
    %129 = arith.index_cast %126 : i32 to index
    %c0_74 = arith.constant 0 : index
    %130 = vector.load %arg4[%c0_73, %129, %c0_74] : memref<1x8x32xf32, #tpu.memory_space<vmem>>, vector<1x1x32xf32>
    %131 = vector.shape_cast %130 : vector<1x1x32xf32> to vector<1x32xf32>
    %c16_i32_75 = arith.constant 16 : i32
    %132 = arith.cmpi sge, %121, %c16_i32_75 : i32
    %133 = arith.select %132, %131, %128 : vector<1x32xf32>
    %134 = arith.index_cast %c7_i32_66 : i32 to index
    %c0_76 = arith.constant 0 : index
    %135 = vector.load %arg8[%134, %c0_76] : memref<8x32xf32, #tpu.memory_space<vmem>>, vector<1x32xf32>
    tpu.vector_store %arg8[%134, %c0_76], %133 {strides = array<i32>} : memref<8x32xf32, #tpu.memory_space<vmem>>, vector<1x32xf32>,
    %c8_i32 = arith.constant 8 : i32
    %c0_77 = arith.constant 0 : index
    %c0_78 = arith.constant 0 : index
    %136 = vector.load %arg6[%c0_77, %c0_78] : memref<8x32xf32, #tpu.memory_space<vmem>>, vector<8x32xf32>
    %c0_79 = arith.constant 0 : index
    %c0_80 = arith.constant 0 : index
    %c0_81 = arith.constant 0 : index
    %137 = vector.load %arg2[%c0_79, %c0_80, %c0_81] : memref<1x8x1xi32, #tpu.memory_space<vmem>>, vector<1x8x1xi32>
    %138 = vector.shape_cast %137 : vector<1x8x1xi32> to vector<8x1xi32>
    %c16_i32_82 = arith.constant 16 : i32
    %139 = vector.broadcast %c16_i32_82 : i32 to vector<8x1xi32>
    %140 = arith.cmpi sge, %138, %139 : vector<8x1xi32>
    %141 = vector.extract_strided_slice %136 {offsets = [2, 0], sizes = [1, 32], strides = [1, 1]} : vector<8x32xf32> to vector<1x32xf32>
    %142 = vector.extract_strided_slice %136 {offsets = [0, 0], sizes = [1, 32], strides = [1, 1]} : vector<8x32xf32> to vector<1x32xf32>
    %143 = vector.shape_cast %140 : vector<8x1xi1> to vector<8x1xi1>
    %144 = vector.broadcast %143 : vector<8x1xi1> to vector<8x32xi1>
    %145 = vector.shape_cast %141 : vector<1x32xf32> to vector<1x32xf32>
    %146 = vector.broadcast %145 : vector<1x32xf32> to vector<8x32xf32>
    %147 = vector.shape_cast %142 : vector<1x32xf32> to vector<1x32xf32>
    %148 = vector.broadcast %147 : vector<1x32xf32> to vector<8x32xf32>
    %149 = arith.select %144, %146, %148 : vector<8x32xi1>, vector<8x32xf32>
    %150 = vector.extract_strided_slice %136 {offsets = [3, 0], sizes = [1, 32], strides = [1, 1]} : vector<8x32xf32> to vector<1x32xf32>
    %151 = vector.extract_strided_slice %136 {offsets = [1, 0], sizes = [1, 32], strides = [1, 1]} : vector<8x32xf32> to vector<1x32xf32>
    %152 = vector.shape_cast %140 : vector<8x1xi1> to vector<8x1xi1>
    %153 = vector.broadcast %152 : vector<8x1xi1> to vector<8x32xi1>
    %154 = vector.shape_cast %150 : vector<1x32xf32> to vector<1x32xf32>
    %155 = vector.broadcast %154 : vector<1x32xf32> to vector<8x32xf32>
    %156 = vector.shape_cast %151 : vector<1x32xf32> to vector<1x32xf32>
    %157 = vector.broadcast %156 : vector<1x32xf32> to vector<8x32xf32>
    %158 = arith.select %153, %155, %157 : vector<8x32xi1>, vector<8x32xf32>
    %c0_83 = arith.constant 0 : index
    %c0_84 = arith.constant 0 : index
    %159 = vector.load %arg8[%c0_83, %c0_84] : memref<8x32xf32, #tpu.memory_space<vmem>>, vector<8x32xf32>
    %cst = arith.constant dense<0.000000e+00> : vector<8xf32>
    %160 = vector.multi_reduction <add>, %159, %cst [1] : vector<8x32xf32> to vector<8xf32>
    %161 = vector.shape_cast %160 : vector<8xf32> to vector<8x1xf32>
    %cst_85 = arith.constant 3.200000e+01 : f32
    %162 = vector.broadcast %cst_85 : f32 to vector<8x1xf32>
    %163 = arith.divf %161, %162 : vector<8x1xf32>
    %164 = vector.broadcast %163 : vector<8x1xf32> to vector<8x32xf32>
    %165 = arith.subf %159, %164 : vector<8x32xf32>
    %166 = arith.mulf %165, %165 : vector<8x32xf32>
    %cst_86 = arith.constant dense<0.000000e+00> : vector<8xf32>
    %167 = vector.multi_reduction <add>, %166, %cst_86 [1] : vector<8x32xf32> to vector<8xf32>
    %168 = vector.shape_cast %167 : vector<8xf32> to vector<8x1xf32>
    %cst_87 = arith.constant 3.200000e+01 : f32
    %169 = vector.broadcast %cst_87 : f32 to vector<8x1xf32>
    %170 = arith.divf %168, %169 : vector<8x1xf32>
    %cst_88 = arith.constant 9.99999996E-13 : f32
    %171 = vector.broadcast %cst_88 : f32 to vector<8x1xf32>
    %172 = arith.addf %170, %171 : vector<8x1xf32>
    %173 = math.rsqrt %172 : vector<8x1xf32>
    %174 = vector.broadcast %173 : vector<8x1xf32> to vector<8x32xf32>
    %175 = arith.mulf %165, %174 : vector<8x32xf32>
    %176 = arith.mulf %175, %149 : vector<8x32xf32>
    %177 = arith.addf %176, %158 : vector<8x32xf32>
    %178 = vector.extract_strided_slice %136 {offsets = [7, 0], sizes = [1, 32], strides = [1, 1]} : vector<8x32xf32> to vector<1x32xf32>
    %179 = vector.extract_strided_slice %136 {offsets = [6, 0], sizes = [1, 32], strides = [1, 1]} : vector<8x32xf32> to vector<1x32xf32>
    %180 = vector.shape_cast %140 : vector<8x1xi1> to vector<8x1xi1>
    %181 = vector.broadcast %180 : vector<8x1xi1> to vector<8x32xi1>
    %182 = vector.shape_cast %178 : vector<1x32xf32> to vector<1x32xf32>
    %183 = vector.broadcast %182 : vector<1x32xf32> to vector<8x32xf32>
    %184 = vector.shape_cast %179 : vector<1x32xf32> to vector<1x32xf32>
    %185 = vector.broadcast %184 : vector<1x32xf32> to vector<8x32xf32>
    %186 = arith.select %181, %183, %185 : vector<8x32xi1>, vector<8x32xf32>
    %c0_89 = arith.constant 0 : index
    %c0_90 = arith.constant 0 : index
    %187 = vector.load %arg5[%c0_89, %c0_90] : memref<8x32xf32, #tpu.memory_space<vmem>>, vector<8x32xf32>
    %188 = arith.addf %187, %186 : vector<8x32xf32>
    %cst_91 = arith.constant dense<0.000000e+00> : vector<8xf32>
    %189 = vector.multi_reduction <add>, %188, %cst_91 [1] : vector<8x32xf32> to vector<8xf32>
    %190 = vector.shape_cast %189 : vector<8xf32> to vector<8x1xf32>
    %cst_92 = arith.constant 3.200000e+01 : f32
    %191 = vector.broadcast %cst_92 : f32 to vector<8x1xf32>
    %192 = arith.divf %190, %191 : vector<8x1xf32>
    %193 = vector.broadcast %192 : vector<8x1xf32> to vector<8x32xf32>
    %194 = arith.subf %188, %193 : vector<8x32xf32>
    %195 = arith.mulf %194, %194 : vector<8x32xf32>
    %cst_93 = arith.constant dense<0.000000e+00> : vector<8xf32>
    %196 = vector.multi_reduction <add>, %195, %cst_93 [1] : vector<8x32xf32> to vector<8xf32>
    %197 = vector.shape_cast %196 : vector<8xf32> to vector<8x1xf32>
    %cst_94 = arith.constant 3.200000e+01 : f32
    %198 = vector.broadcast %cst_94 : f32 to vector<8x1xf32>
    %199 = arith.divf %197, %198 : vector<8x1xf32>
    %cst_95 = arith.constant 9.99999996E-13 : f32
    %200 = vector.broadcast %cst_95 : f32 to vector<8x1xf32>
    %201 = arith.addf %199, %200 : vector<8x1xf32>
    %202 = math.rsqrt %201 : vector<8x1xf32>
    %203 = vector.broadcast %202 : vector<8x1xf32> to vector<8x32xf32>
    %204 = arith.mulf %194, %203 : vector<8x32xf32>
    %205 = vector.extract_strided_slice %136 {offsets = [4, 0], sizes = [1, 32], strides = [1, 1]} : vector<8x32xf32> to vector<1x32xf32>
    %206 = vector.broadcast %205 : vector<1x32xf32> to vector<8x32xf32>
    %207 = arith.mulf %204, %206 : vector<8x32xf32>
    %208 = vector.extract_strided_slice %136 {offsets = [5, 0], sizes = [1, 32], strides = [1, 1]} : vector<8x32xf32> to vector<1x32xf32>
    %209 = vector.broadcast %208 : vector<1x32xf32> to vector<8x32xf32>
    %210 = arith.addf %207, %209 : vector<8x32xf32>
    %211 = arith.addf %177, %210 : vector<8x32xf32>
    %c0_96 = arith.constant 0 : index
    %c0_97 = arith.constant 0 : index
    %c0_98 = arith.constant 0 : index
    %212 = vector.load %arg7[%c0_96, %c0_97, %c0_98] : memref<1x8x32xf32, #tpu.memory_space<vmem>>, vector<1x8x32xf32>
    %213 = vector.shape_cast %212 : vector<1x8x32xf32> to vector<8x32xf32>
    %214 = vector.shape_cast %211 : vector<8x32xf32> to vector<1x8x32xf32>
    tpu.vector_store %arg7[%c0_96, %c0_97, %c0_98], %214 {strides = array<i32>} : memref<1x8x32xf32, #tpu.memory_space<vmem>>, vector<1x8x32xf32>,
    return
  }
  func.func @transform_0(%arg0: i32, %arg1: memref<2x8xi32, #tpu.memory_space<smem>>) -> (i32, i32, i32) {
    %c0_i32 = arith.constant 0 : i32
    %c0_i32_0 = arith.constant 0 : i32
    %c0_i32_1 = arith.constant 0 : i32
    return %arg0, %c0_i32, %c0_i32_0 : i32, i32, i32
  }
  func.func @transform_1(%arg0: i32, %arg1: memref<2x8xi32, #tpu.memory_space<smem>>) -> (i32, i32) {
    %c0_i32 = arith.constant 0 : i32
    %c0_i32_0 = arith.constant 0 : i32
    %c0_i32_1 = arith.constant 0 : i32
    return %c0_i32, %c0_i32_0 : i32, i32
  }
  func.func @transform_2(%arg0: i32, %arg1: memref<2x8xi32, #tpu.memory_space<smem>>) -> (i32, i32, i32) {
    %c0_i32 = arith.constant 0 : i32
    %c0_i32_0 = arith.constant 0 : i32
    %c0_i32_1 = arith.constant 0 : i32
    return %arg0, %c0_i32, %c0_i32_0 : i32, i32, i32
  }
  func.func @transform_3(%arg0: i32, %arg1: memref<2x8xi32, #tpu.memory_space<smem>>) -> (i32, i32) {
    %c0_i32 = arith.constant 0 : i32
    %c0_i32_0 = arith.constant 0 : i32
    %c0_i32_1 = arith.constant 0 : i32
    return %c0_i32, %c0_i32_0 : i32, i32
  }
  func.func @transform_4(%arg0: i32, %arg1: memref<2x8xi32, #tpu.memory_space<smem>>) -> (i32, i32) {
    %c0_i32 = arith.constant 0 : i32
    %c0_i32_0 = arith.constant 0 : i32
    %c0_i32_1 = arith.constant 0 : i32
    return %c0_i32, %c0_i32_0 : i32, i32
  }
  func.func @transform_5(%arg0: i32, %arg1: memref<2x8xi32, #tpu.memory_space<smem>>) -> (i32, i32, i32) {
    %c0_i32 = arith.constant 0 : i32
    %c0_i32_0 = arith.constant 0 : i32
    %c0_i32_1 = arith.constant 0 : i32
    return %arg0, %c0_i32, %c0_i32_0 : i32, i32, i32
  }
}

</mosaic_0001>

<bundles_post_ra>
// kernel: tpu_custom_call.1
= control target key start
LH: loop header
LB: loop body
LE: loop exit
PB: predicated region body
PF: predicated region fallthrough
CT: control target
= control target key end

     0   :  { %s980_s21 = smov [#allocation4]   ;;  %s1301_s0 = inlined_call_operand.hbm [shape: s32[2,8], index: 0, kind: input, shape index: {}]   ;;  %s1302_s1 = inlined_call_operand.vmem [shape: s32[2,8,1], index: 1, kind: input, shape index: {}]   ;;  %s1303_s2 = inlined_call_operand.vmem [shape: f32[16,32], index: 2, kind: input, shape index: {}]   ;;  %s1304_s3 = inlined_call_operand.hbm [shape: f32[2,8,32], index: 3, kind: input, shape index: {}]   ;;  %s1305_s4 = inlined_call_operand.vmem [shape: f32[8,32], index: 4, kind: input, shape index: {}]   ;;  %s1306_s5 = inlined_call_operand.hbm [shape: f32[8,32], index: 5, kind: input, shape index: {}]   ;;  %s1307_s6 = inlined_call_operand.hbm [shape: f32[2,8,32], index: 6, kind: output, shape index: {}]  }
   0x1   :  { %12 = dma.hbm_to_smem %s1301_s0, 32, %s980_s21, [#allocation3] }
   0x2   :  { %950 = dma.done.wait [#allocation3], 32 }
   0x3   :  { %951 = vsyncadd [#allocation3], 4294967264 }
   0x4   :  { %14 = sfence }
   0x5   :  { %15 = vsyncpa [#allocation6], 0 }
   0x6   :  { %17 = vsyncpa [#allocation6 + $0x1], 0 }
   0x7   :  { %18 = vsyncpa [#allocation9], 0 }
   0x8   :  { %19 = vsyncpa [#allocation7], 0 }
   0x9   :  { %21 = vsyncpa [#allocation7 + $0x1], 0  ;;  %s1023_s24 = smov 0   ;;  %s1025_s25 = smov 0  }
   0xa   :  { %s1027_s26 = smov 0   ;;  %s1029_s27 = smov 0  }
   0xb LB: > { %s1044_s0 = sadd.s32 4294967295, %s978_s27   ;;  %s646_s28 = sadd.s32 4294967294, %s978_s27   ;;  %s978_s27 = sphi %s1029_s27, %s1330_s27   ;;  %s974_s26 = sphi %s1027_s26, %s1329_s26   ;;  %s970_s25 = sphi %s1025_s25, %s1328_s25   ;;  %s966_s24 = sphi %s1023_s24, %s1327_s24  }
   0xc   : > { %p94_p0 = scmp.ne.s32.totalorder %s970_s25, %s966_s24  ;;  %p1308_p1 = scmp.eq.s32.totalorder %s1044_s0, 0 }
   0xd   : > { %p166_p3 = scmp.eq.s32.totalorder %s646_s28, 1  ;;  %p647_p5 = scmp.ge.s32.totalorder %s978_s27, 1 }
   0xe   : > { %p1053_p4 = por %p1308_p1, %p94_p0  ;;  %p173_p7 = scmp.lt.s32.totalorder %s978_s27, 3 }
   0xf   : > { %p1058_p6 = por %p166_p3, %p94_p0  ;;  %s981_s8 = smov [#allocation8]  }
  0x10   : > { %s1312_s29 = scalar_select %p1053_p4, 1, 0 }
  0x11   : > { %s1313_s30 = scalar_select %p1058_p6, 1, 0 }
  0x12   : > { %p1063_p8 = pnand %p647_p5, %p173_p7  ;;  %s192_s9 = sshll.u32 %s981_s8, 4  ;;  %s193_s9 = int_to_ptr.vmem [resolvable:$true] %s192_s9 }
  0x13   : > { %s1071_s10 = sadd.s32 1, %s978_s27   ;;  %s81_s14 = sadd.s32 1, %s974_s26 }
  0x14   : > { %s1314_s7 = scalar_select %p1063_p8, 1, 0 }
  0x15   : > { %p790_p10 = pneg %p1063_p8  ;;  %s78_s12 = ssub.s32 %s978_s27, %s1071_s10 }
  0x16   : > { %p1081_p12 = scmp.eq.s32.totalorder %s78_s12, 0  ;;  %p88_p13 = scmp.ne.s32.totalorder %s974_s26, %s970_s25 }
  0x17   : > { %p1075_p11 = pnand %p790_p10, %p1308_p1  ;;  %s865_s15 = scalar_lea.vmem %s193_s9, 128 }
  0x18   : > { %p866_p3 = scmp.ne.s32.totalorder %s193_s9, %s865_s15  ;;  %p873_p9 = scmp.lt.s32.totalorder %s193_s9, %s193_s9 }
  0x19   : > { %p856_p0 = pneg %p1075_p11  ;;  %p874_p2 = scmp.lt.s32.totalorder %s865_s15, %s865_s15 }
  0x1b   : > { %p868_p5 = pnand %p866_p3, %p856_p0  ;;  %p875_p10 = por %p874_p2, %p873_p9 }
  0x1d   : > { %p869_p7 = pneg %p868_p5 }
  0x1f   : > { %p876_p1 = pnand %p875_p10, %p869_p7 }
  0x21   : > { %879 = shalt.err (!%p876_p1)
}
  0x22   : > { %793 = dma.hbm_to_vmem [thread:$0]  (!%p1075_p11), %s1306_s5, 128, %s193_s9, [#allocation9]  }
  0x23   : > { %s1098_s18 = scalar_select %p1081_p12, %s974_s26, %s81_s14  }
  0x24   : > { %p89_p1 = scmp.eq.s32.totalorder %s978_s27, 0  ;;  %p1317_p2 = scmp.eq.s32.totalorder %s1044_s0, 1 }
  0x25   : > { %p803_p0 = scmp.lt.s32.totalorder %s978_s27, 2  ;;  %s210_s20 = sand.u32 1, %s974_s26  }
  0x26   : > { %p1106_p9 = por %p1317_p2, %p88_p13  ;;  %p90_p3 = por %p89_p1, %p88_p13 }
  0x27   : > { %s650_s21 = sshll.u32 %s210_s20, 3  ;;  %s651_s22 = sshll.u32 %s978_s27, 7 }
  0x28   : > { %s1318_s19 = scalar_select %p1106_p9, 1, 0 }
  0x29   : > { %s1119_s8 = scalar_lea.hbm %s1304_s3, %s651_s22  ;;  %s214_s9 = scalar_lea.vmem [#allocation5], %s650_s21 }
  0x2a   : > { %s221_s11 = sshll.u32 %s214_s9, 4  ;;  %p1121_p11 = pnand %p803_p0, %p90_p3  ;;  %s222_s11 = int_to_ptr.vmem [resolvable:$true] %s221_s11 }
  0x2b   : > { %s211_s13 = scalar_lea.sflag [#allocation6], %s210_s20  ;;  %s880_s14 = scalar_lea.hbm %s1119_s8, 128 }
  0x2c   : > { %p881_p12 = scmp.ne.s32.totalorder %s1119_s8, %s880_s14  ;;  %p882_p13 = pneg %p1121_p11 }
  0x2d   : > { %s885_s17 = scalar_lea.hbm %s1304_s3, 256  ;;  %p886_p10 = scmp.lt.s32.totalorder %s1119_s8, %s1304_s3 }
  0x2e   : > { %p883_p5 = pnand %p882_p13, %p881_p12  ;;  %p887_p1 = scmp.lt.s32.totalorder %s885_s17, %s880_s14 }
  0x30   : > { %p884_p7 = pneg %p883_p5  ;;  %p888_p2 = por %p887_p1, %p886_p10 }
  0x32   : > { %p889_p0 = pnand %p888_p2, %p884_p7 }
  0x34   : > { %892 = shalt.err (!%p889_p0)
}
  0x35   : > { %s893_s23 = scalar_lea.vmem %s222_s11, 128  ;;  %s982_s20 = smov [#allocation5]  }
  0x36   : > { %p894_p3 = scmp.ne.s32.totalorder %s222_s11, %s893_s23  ;;  %s898_s28 = sshll.u32 %s982_s20, 4  ;;  %s899_s28 = int_to_ptr.vmem [resolvable:$false] %s898_s28 }
  0x37   : > { %s900_s9 = scalar_lea.vmem %s899_s28, 256  ;;  %p901_p12 = scmp.lt.s32.totalorder %s222_s11, %s899_s28 }
  0x38   : > { %p896_p6 = pnand %p894_p3, %p882_p13  ;;  %p902_p5 = scmp.lt.s32.totalorder %s900_s9, %s893_s23 }
  0x3a   : > { %p897_p9 = pneg %p896_p6  ;;  %p903_p4 = por %p902_p5, %p901_p12 }
  0x3c   : > { %p904_p8 = pnand %p903_p4, %p897_p9 }
  0x3e   : > { %907 = shalt.err (!%p904_p8)
}
  0x3f   : > { %797 = dma.hbm_to_vmem [thread:$0]  (!%p1121_p11), %s1119_s8, 128, %s222_s11, %s211_s13  }
  0x40   : > { %p1320_p7 = scmp.ne.s32.totalorder %s1314_s7, 0 }
  0x41   : > { %s1142_s14 = sand.u32 (!%p1320_p7), 1, %s970_s25   ;;  %p1321_p4 = scmp.ne.s32.totalorder (!%p1320_p7), %s1312_s29, 0 }
  0x42   : > { %230 = sbr.rel (%p1320_p7) target bundleno = 534 (0x216), region = 40  ;;  %s653_s15 = sshll.u32 (!%p1320_p7), %s1142_s14, 3 }
  0x43   : > { %s233_s16 = scalar_lea.sflag (!%p1320_p7), [#allocation6], %s1142_s14  ;;  %s1148_s17 = scalar_lea.vmem (!%p1320_p7), [#allocation5], %s653_s15 }
  0x47   : > { %953 = dma.done.wait (%p1321_p4), %s233_s16, 128  }
  0x48   : > { %955 = vsyncadd (%p1321_p4), %s233_s16, 4294967168  ;;  %p1322_p6 = scmp.eq.s32.totalorder %s1044_s0, 0 }
  0x4a   : > { %957 = dma.done.wait (%p1322_p6), [#allocation9], 128   ;;  %p1323_p8 = pmov %p1322_p6 }
  0x4b   : > { %p271_p9 = scmp.lt.s32.totalorder %s1044_s0, 1  ;;  %s1160_s7 = sshll.u32 %s1044_s0, 7  ;;  %v983_v0 = vmov 0   ;;  %vm295_vm1 = vcmask 253952   ;;  %vm471_vm10 = vcmask 261120   ;;  %v452_v37 = vlaneseq  ;;  %v444_v41 = vld [vmem:[#allocation8] sm:$0xff] }
  0x4c   : > { %959 = vsyncadd (%p1323_p8), [#allocation9], 4294967168  ;;  %841 = vset.pattern.permute.xlu0 %v983_v0  ;;  %s276_s29 = sld [smem:[#allocation4 + %s1160_s7]]  ;;  %s297_s8 = sadd.s32 1, %s1160_s7  ;;  %v497_v45 = vld [vmem:[%s1305_s4] sm:$0xff] }
  0x4d   : > { %s1332_s0 = smov (!%p271_p9, %s1044_s0), 1  ;;  %s1165_s11 = sld [smem:[#allocation4 + %s297_s8]]  ;;  %v453_v38 = vshrl.u32 %v452_v37, 7 }
  0x4e   : > { %s318_s12 = sadd.s32 2, %s1160_s7  ;;  %s656_s13 = sshll.u32 %s1332_s0, 3 }
  0x4f   : > { %s1168_s22 = sld [smem:[#allocation4 + %s318_s12]]  ;;  %s274_s20 = scalar_lea.vmem %s1302_s1, %s656_s13  ;;  %v490_v39 = vsub.s32 7, %v453_v38  ;;  %v494_v40 = vsub.s32 6, %v453_v38 }
  0x50   : > { %s339_s28 = sadd.s32 3, %s1160_s7  ;;  %s360_s16 = sadd.s32 4, %s1160_s7  ;;  %v445_v1 = vld [vmem:[%s274_s20] sm:$0xff] }
  0x51   : > { %s1174_s9 = sld [smem:[#allocation4 + %s339_s28]]  ;;  %vm446_vm0 = vcmp.ge.s32.totalorder %v445_v1, 16  ;;  %v491_v42 = vrot.slane %v444_v41, %v490_v39  ;;  %v495_v43 = vrot.slane %v444_v41, %v494_v40  ;;  %v454_v1 = vsub.s32 2, %v453_v38 }
  0x52   : > { %p277_p11 = scmp.gt.s32.totalorder %s276_s29, 0  ;;  %p658_p13 = scmp.lt.s32.totalorder %s276_s29, 15  ;;  %v447_v2 = vsel %vm446_vm0, 1, %v983_v0 }
  0x53   : > { %s663_s8 = sadd.s32 4294967280, %s276_s29  ;;  %p290_p10 = scmp.ge.s32.totalorder %s276_s29, 16  ;;  %449 = vperm.xlu0 %841, %v447_v2   ;;  %v458_v2 = vsub.s32 0, %v453_v38 }
  0x54   : > { %s1334_s29 = smov (!%p277_p11, %s276_s29), 0  ;;  %p282_p1 = scmp.gt.s32.totalorder %s663_s8, 0 }
  0x55   : > { %p664_p2 = scmp.lt.s32.totalorder %s663_s8, 7  ;;  %s1336_s29 = smov (!%p658_p13, %s1334_s29), 15 }
  0x56   : > { %s1338_s8 = smov (!%p282_p1, %s663_s8), 0  ;;  %s286_s13 = scalar_lea.vmem %s1303_s2, %s1336_s29 }
  0x57   : > { %p299_p0 = scmp.gt.s32.totalorder %s1165_s11, 0  ;;  %s1340_s8 = smov (!%p664_p2, %s1338_s8), 7  ;;  %v287_v3 = vld [vmem:[%s286_s13] sm:$0x1] }
  0x58   : > { %s291_s21 = scalar_select %p290_p10, 1, 0 }
  0x59   : > { %s288_s23 = scalar_lea.vmem %s1148_s17, %s1340_s8 [#allocation5]  ;;  %p669_p3 = scmp.lt.s32.totalorder %s1165_s11, 15 }
  0x5a   : > { %v289_v4 = vld [vmem:[%s288_s23] sm:$0x1]  ;;  %v292_v5 = vstv %s291_s21  ;;  %s300_s20 = scalar_select %p299_p0, %s1165_s11, 0 }
  0x5b   : > { %vm293_vm2 = vcmp.eq.s32.totalorder %v292_v5, 1  ;;  %s674_s28 = sadd.s32 4294967280, %s1165_s11  ;;  %p312_p12 = scmp.ge.s32.totalorder %s1165_s11, 16  ;;  %v463_v5 = vsub.s32 3, %v453_v38 }
  0x5c   : > { %v294_v6 = vsel %vm293_vm2, %v289_v4, %v287_v3  ;;  %s1342_s20 = smov (!%p669_p3, %s300_s20), 15  ;;  %p304_p5 = scmp.gt.s32.totalorder %s674_s28, 0  ;;  %v514_v4 = vsub.s32 4, %v453_v38 }
  0x5d   : > { %296 = vst.msk [vmem:[#allocation2] sm:$0x1] %vm295_vm1, %v294_v6  ;;  %p675_p7 = scmp.lt.s32.totalorder %s674_s28, 7  ;;  %s308_s0 = scalar_lea.vmem %s1303_s2, %s1342_s20  ;;  %v467_v6 = vsub.s32 1, %v453_v38 }
  0x5e   : > { %p320_p4 = scmp.gt.s32.totalorder %s1168_s22, 0  ;;  %s1344_s28 = smov (!%p304_p5, %s674_s28), 0  ;;  %v309_v7 = vld [vmem:[%s308_s0] sm:$0x1] }
  0x5f   : > { %s313_s12 = scalar_select %p312_p12, 1, 0 }
  0x60   : > { %s1346_s28 = smov (!%p675_p7, %s1344_s28), 7  ;;  %p680_p6 = scmp.lt.s32.totalorder %s1168_s22, 15 }
  0x61   : > { %v314_v8 = vstv %s313_s12  ;;  %s321_s11 = scalar_select %p320_p4, %s1168_s22, 0 }
  0x62   : > { %s310_s13 = scalar_lea.vmem %s1148_s17, %s1346_s28 [#allocation5]  ;;  %vm315_vm3 = vcmp.eq.s32.totalorder %v314_v8, 1  ;;  %s685_s21 = sadd.s32 4294967280, %s1168_s22  ;;  %v459_v8 = vrot.slane %v444_v41, %v458_v2 }
  0x63   : > { %v311_v9 = vld [vmem:[%s310_s13] sm:$0x1]  ;;  %p333_p8 = scmp.ge.s32.totalorder %s1168_s22, 16  ;;  %s1348_s11 = smov (!%p680_p6, %s321_s11), 15 }
  0x64   : > { %v316_v10 = vsel %vm315_vm3, %v311_v9, %v309_v7  ;;  %p325_p9 = scmp.gt.s32.totalorder %s685_s21, 0  ;;  %p686_p11 = scmp.lt.s32.totalorder %s685_s21, 7  ;;  %v455_v7 = vrot.slane %v444_v41, %v454_v1 }
  0x65   : > { %317 = vst.msk [vmem:[#allocation2 + $0x1] sm:$0x1] %vm295_vm1, %v316_v10  ;;  %s329_s28 = scalar_lea.vmem %s1303_s2, %s1348_s11  ;;  %p341_p13 = scmp.gt.s32.totalorder %s1174_s9, 0  ;;  %v519_v10 = vsub.s32 5, %v453_v38 }
  0x66   : > { %s1350_s21 = smov (!%p325_p9, %s685_s21), 0  ;;  %v330_v11 = vld [vmem:[%s329_s28] sm:$0x1]  ;;  %p691_p10 = scmp.lt.s32.totalorder %s1174_s9, 15 }
  0x67   : > { %s334_s29 = scalar_select %p333_p8, 1, 0 }
  0x68   : > { %s1352_s21 = smov (!%p686_p11, %s1350_s21), 7  ;;  %s696_s0 = sadd.s32 4294967280, %s1174_s9 }
  0x69   : > { %v335_v12 = vstv %s334_s29  ;;  %s342_s22 = scalar_select %p341_p13, %s1174_s9, 0 }
  0x6a   : > { %s331_s8 = scalar_lea.vmem %s1148_s17, %s1352_s21 [#allocation5]  ;;  %vm336_vm4 = vcmp.eq.s32.totalorder %v335_v12, 1  ;;  %p354_p1 = scmp.ge.s32.totalorder %s1174_s9, 16 }
  0x6b   : > { %v332_v13 = vld [vmem:[%s331_s8] sm:$0x1]  ;;  %s1354_s22 = smov (!%p691_p10, %s342_s22), 15  ;;  %p346_p2 = scmp.gt.s32.totalorder %s696_s0, 0 }
  0x6c   : > { %v337_v14 = vsel %vm336_vm4, %v332_v13, %v330_v11  ;;  %p697_p0 = scmp.lt.s32.totalorder %s696_s0, 7  ;;  %s350_s13 = scalar_lea.vmem %s1303_s2, %s1354_s22  ;;  %v515_v11 = vrot.slane %v444_v41, %v514_v4 }
  0x6d   : > { %338 = vst.msk [vmem:[#allocation2 + $0x2] sm:$0x1] %vm295_vm1, %v337_v14  ;;  %s361_s21 = sld [smem:[#allocation4 + %s360_s16]]  ;;  %s1356_s0 = smov (!%p346_p2, %s696_s0), 0  ;;  %v351_v15 = vld [vmem:[%s350_s13] sm:$0x1]  ;;  %v464_v14 = vrot.slane %v444_v41, %v463_v5 }
  0x6e   : > { %s355_s23 = scalar_select %p354_p1, 1, 0 }
  0x6f   : > { %s1358_s0 = smov (!%p697_p0, %s1356_s0), 7  ;;  %s381_s20 = sadd.s32 5, %s1160_s7 }
  0x70   : > { %v356_v16 = vstv %s355_s23  ;;  %s402_s28 = sadd.s32 6, %s1160_s7  ;;  %s352_s9 = scalar_lea.vmem %s1148_s17, %s1358_s0 [#allocation5] }
  0x71   : > { %vm357_vm5 = vcmp.eq.s32.totalorder %v356_v16, 1  ;;  %s1215_s29 = sld [smem:[#allocation4 + %s381_s20]]  ;;  %v353_v17 = vld [vmem:[%s352_s9] sm:$0x1]  ;;  %s423_s8 = sadd.s32 7, %s1160_s7 }
  0x72   : > { %v358_v18 = vsel %vm357_vm5, %v353_v17, %v351_v15  ;;  %v468_v15 = vrot.slane %v444_v41, %v467_v6 }
  0x73   : > { %p362_p3 = scmp.gt.s32.totalorder %s361_s21, 0  ;;  %p702_p12 = scmp.lt.s32.totalorder %s361_s21, 15  ;;  %359 = vst.msk [vmem:[#allocation2 + $0x3] sm:$0x1] %vm295_vm1, %v358_v18  ;;  %v520_v18 = vrot.slane %v444_v41, %v519_v10 }
  0x74   : > { %s707_s22 = sadd.s32 4294967280, %s361_s21  ;;  %p375_p5 = scmp.ge.s32.totalorder %s361_s21, 16 }
  0x75   : > { %s1360_s21 = smov (!%p362_p3, %s361_s21), 0  ;;  %p367_p7 = scmp.gt.s32.totalorder %s707_s22, 0 }
  0x76   : > { %p708_p4 = scmp.lt.s32.totalorder %s707_s22, 7  ;;  %s1362_s21 = smov (!%p702_p12, %s1360_s21), 15 }
  0x77   : > { %s1364_s22 = smov (!%p367_p7, %s707_s22), 0  ;;  %s371_s0 = scalar_lea.vmem %s1303_s2, %s1362_s21 }
  0x78   : > { %p383_p6 = scmp.gt.s32.totalorder %s1215_s29, 0  ;;  %s1366_s22 = smov (!%p708_p4, %s1364_s22), 7  ;;  %v372_v19 = vld [vmem:[%s371_s0] sm:$0x1] }
  0x79   : > { %s376_s12 = scalar_select %p375_p5, 1, 0 }
  0x7a   : > { %s373_s11 = scalar_lea.vmem %s1148_s17, %s1366_s22 [#allocation5]  ;;  %p713_p8 = scmp.lt.s32.totalorder %s1215_s29, 15 }
  0x7b   : > { %v374_v20 = vld [vmem:[%s373_s11] sm:$0x1]  ;;  %v377_v21 = vstv %s376_s12  ;;  %s384_s13 = scalar_select %p383_p6, %s1215_s29, 0 }
  0x7c   : > { %vm378_vm6 = vcmp.eq.s32.totalorder %v377_v21, 1  ;;  %s718_s23 = sadd.s32 4294967280, %s1215_s29  ;;  %p396_p9 = scmp.ge.s32.totalorder %s1215_s29, 16 }
  0x7d   : > { %v379_v22 = vsel %vm378_vm6, %v374_v20, %v372_v19  ;;  %s1368_s13 = smov (!%p713_p8, %s384_s13), 15  ;;  %p388_p11 = scmp.gt.s32.totalorder %s718_s23, 0 }
  0x7e   : > { %380 = vst.msk [vmem:[#allocation2 + $0x4] sm:$0x1] %vm295_vm1, %v379_v22  ;;  %p719_p13 = scmp.lt.s32.totalorder %s718_s23, 7  ;;  %s392_s9 = scalar_lea.vmem %s1303_s2, %s1368_s13 }
  0x7f   : > { %s403_s22 = sld [smem:[#allocation4 + %s402_s28]]  ;;  %s1370_s23 = smov (!%p388_p11, %s718_s23), 0  ;;  %v393_v23 = vld [vmem:[%s392_s9] sm:$0x1] }
  0x80   : > { %s397_s16 = scalar_select %p396_p9, 1, 0 }
  0x81   : > { %s1372_s23 = smov (!%p719_p13, %s1370_s23), 7  ;;  %s1235_s29 = sld [smem:[#allocation4 + %s423_s8]] }
  0x82   : > { %v398_v24 = vstv %s397_s16  ;;  %s394_s0 = scalar_lea.vmem %s1148_s17, %s1372_s23 [#allocation5]  ;;  %s270_s28 = scalar_lea.vmem [#allocation10], %s653_s15 }
  0x83   : > { %vm399_vm7 = vcmp.eq.s32.totalorder %v398_v24, 1  ;;  %v395_v25 = vld [vmem:[%s394_s0] sm:$0x1]  ;;  %s538_s11 = sshll.u32 %s270_s28, 4  ;;  %p1324_p9 = scmp.ne.s32.totalorder %s1318_s19, 0  ;;  %s539_s11 = int_to_ptr.vmem [resolvable:$true] %s538_s11 }
  0x84   : > { %v400_v26 = vsel %vm399_vm7, %v395_v25, %v393_v23 }
  0x85   : > { %p404_p10 = scmp.gt.s32.totalorder %s403_s22, 0  ;;  %p724_p1 = scmp.lt.s32.totalorder %s403_s22, 15  ;;  %401 = vst.msk [vmem:[#allocation2 + $0x5] sm:$0x1] %vm295_vm1, %v400_v26 }
  0x86   : > { %s729_s12 = sadd.s32 4294967280, %s403_s22  ;;  %p417_p2 = scmp.ge.s32.totalorder %s403_s22, 16 }
  0x87   : > { %s1374_s22 = smov (!%p404_p10, %s403_s22), 0  ;;  %p409_p0 = scmp.gt.s32.totalorder %s729_s12, 0 }
  0x88   : > { %p730_p3 = scmp.lt.s32.totalorder %s729_s12, 7  ;;  %s1376_s22 = smov (!%p724_p1, %s1374_s22), 15 }
  0x89   : > { %s1378_s12 = smov (!%p409_p0, %s729_s12), 0  ;;  %s413_s13 = scalar_lea.vmem %s1303_s2, %s1376_s22 }
  0x8a   : > { %p425_p12 = scmp.gt.s32.totalorder %s1235_s29, 0  ;;  %s1380_s12 = smov (!%p730_p3, %s1378_s12), 7  ;;  %v414_v27 = vld [vmem:[%s413_s13] sm:$0x1] }
  0x8b   : > { %s418_s23 = scalar_select %p417_p2, 1, 0 }
  0x8c   : > { %s415_s21 = scalar_lea.vmem %s1148_s17, %s1380_s12 [#allocation5]  ;;  %p735_p5 = scmp.lt.s32.totalorder %s1235_s29, 15 }
  0x8d   : > { %v416_v28 = vld [vmem:[%s415_s21] sm:$0x1]  ;;  %v419_v29 = vstv %s418_s23  ;;  %s426_s20 = scalar_select %p425_p12, %s1235_s29, 0 }
  0x8e   : > { %vm420_vm8 = vcmp.eq.s32.totalorder %v419_v29, 1  ;;  %s740_s9 = sadd.s32 4294967280, %s1235_s29  ;;  %p438_p7 = scmp.ge.s32.totalorder %s1235_s29, 16 }
  0x8f   : > { %v421_v30 = vsel %vm420_vm8, %v416_v28, %v414_v27  ;;  %s1382_s20 = smov (!%p735_p5, %s426_s20), 15  ;;  %p430_p4 = scmp.gt.s32.totalorder %s740_s9, 0 }
  0x90   : > { %422 = vst.msk [vmem:[#allocation2 + $0x6] sm:$0x1] %vm295_vm1, %v421_v30  ;;  %p741_p6 = scmp.lt.s32.totalorder %s740_s9, 7  ;;  %s434_s8 = scalar_lea.vmem %s1303_s2, %s1382_s20 }
  0x91   : > { %s1384_s9 = smov (!%p430_p4, %s740_s9), 0  ;;  %v435_v31 = vld [vmem:[%s434_s8] sm:$0x1]  ;;  %s536_s21 = scalar_lea.hbm %s1307_s6, %s1160_s7 }
  0x92   : > { %s439_s0 = scalar_select %p438_p7, 1, 0 }
  0x93   : > { %s1386_s9 = smov (!%p741_p6, %s1384_s9), 7  ;;  %s525_s20 = scalar_lea.sflag [#allocation7], %s1142_s14 }
  0x94   : > { %v440_v32 = vstv %s439_s0  ;;  %s436_s12 = scalar_lea.vmem %s1148_s17, %s1386_s9 [#allocation5]  ;;  %s908_s9 = scalar_lea.vmem %s539_s11, 128 }
  0x95   : > { %vm441_vm9 = vcmp.eq.s32.totalorder %v440_v32, 1  ;;  %v437_v33 = vld [vmem:[%s436_s12] sm:$0x1]  ;;  %p909_p8 = scmp.ne.s32.totalorder %s539_s11, %s908_s9  ;;  %s984_s22 = smov [#allocation10]  }
  0x96   : > { %v442_v34 = vsel %vm441_vm9, %v437_v33, %v435_v31  ;;  %s912_s16 = sshll.u32 %s984_s22, 4  ;;  %s913_s16 = int_to_ptr.vmem [resolvable:$false] %s912_s16 }
  0x97   : > { %443 = vst.msk [vmem:[#allocation2 + $0x7] sm:$0x1] %vm295_vm1, %v442_v34  ;;  %p910_p11 = pnand %p909_p8, %p1324_p9  ;;  %s914_s15 = scalar_lea.vmem %s913_s16, 256 }
  0x98   : > { %p915_p10 = scmp.lt.s32.totalorder %s539_s11, %s913_s16  ;;  %p916_p1 = scmp.lt.s32.totalorder %s914_s15, %s908_s9 }
  0x99   : > { %p911_p13 = pneg %p910_p11 }
  0x9a   : > { %p917_p2 = por %p916_p1, %p915_p10 }
  0x9c   : > { %p918_p0 = pnand %p917_p2, %p911_p13 }
  0x9e   : > { %v470_v35 = vld [vmem:[#allocation2] sm:$0xff] }
  0x9f   : > { %v472_v36 = vsel %vm471_vm10, %v470_v35, 0.0 }
  0xa0   : > { %473 = vadd.xlane.f32.xlu0 %v472_v36 }
  0xce   : > { %v450_v44 = vpop.permute.xlu0 %449 }
  0xcf   : > { %vm451_vm11 = vcmp.eq.s32.totalorder %v450_v44, 1 }
  0xd0   : > { %v496_v46 = vsel %vm451_vm11, %v491_v42, %v495_v43  ;;  %v460_v13 = vsel %vm451_vm11, %v455_v7, %v459_v8  ;;  %v469_v20 = vsel %vm451_vm11, %v464_v14, %v468_v15 }
  0xd1   : > { %v498_v47 = vadd.f32 %v497_v45, %v496_v46 }
  0xd3   : > { %v499_v48 = vsel %vm471_vm10, %v498_v47, 0.0 }
  0xd4   : > { %500 = vadd.xlane.f32.xlu1 %v499_v48 }
 0x129   : > { %v474_v49 = vpop.xlane.xlu0 %473 }
 0x12a   : > { %v476_v50 = vmul.f32 0.03125, %v474_v49 }
 0x12c   : > { %v477_v51 = vsub.f32 %v470_v35, %v476_v50 }
 0x12e   : > { %v478_v52 = vmul.f32 %v477_v51, %v477_v51 }
 0x130   : > { %v479_v53 = vsel %vm471_vm10, %v478_v52, 0.0 }
 0x131   : > { %480 = vadd.xlane.f32.xlu1 %v479_v53 }
 0x15d   : > { %v501_v54 = vpop.xlane.xlu1 %500 }
 0x15e   : > { %v502_v55 = vmul.f32 0.03125, %v501_v54 }
 0x160   : > { %v503_v56 = vsub.f32 %v498_v47, %v502_v55 }
 0x162   : > { %v504_v57 = vmul.f32 %v503_v56, %v503_v56 }
 0x164   : > { %v505_v58 = vsel %vm471_vm10, %v504_v57, 0.0 }
 0x165   : > { %506 = vadd.xlane.f32.xlu1 %v505_v58 }
 0x1ba   : > { %v481_v59 = vpop.xlane.xlu1 %480 }
 0x1bb   : > { %v482_v60 = vmul.f32 0.03125, %v481_v59 }
 0x1bd   : > { %v483_v61 = vadd.f32 1e-12, %v482_v60 }
 0x1bf   : > { %842 = vrsqrt.f32 %v483_v61 }
 0x1cc   : > { %v843_v3 = vpop.eup %842 }
 0x1cd   : > { %v485_v9 = vmul.f32 %v843_v3, %v477_v51 }
 0x1cf   : > { %v486_v16 = vmul.f32 %v485_v9, %v460_v13 }
 0x1d1   : > { %v487_v21 = vadd.f32 %v486_v16, %v469_v20 }
 0x1ee   : > { %v507_v62 = vpop.xlane.xlu1 %506 }
 0x1ef   : > { %v508_v63 = vmul.f32 0.03125, %v507_v62 }
 0x1f1   : > { %v509_v0 = vadd.f32 1e-12, %v508_v63 }
 0x1f3   : > { %844 = vrsqrt.f32 %v509_v0 }
 0x200   : > { %v845_v12 = vpop.eup %844 }
 0x201   : > { %v511_v17 = vmul.f32 %v845_v12, %v503_v56 }
 0x203   : > { %v516_v19 = vmul.f32 %v515_v11, %v511_v17 }
 0x205   : > { %v521_v22 = vadd.f32 %v520_v18, %v516_v19 }
 0x207   : > { %v522_v23 = vadd.f32 %v521_v22, %v487_v21 }
 0x209   : > { %523 = vst.msk [vmem:[%s270_s28] sm:$0xff] %vm471_vm10, %v522_v23 }
 0x20a   : > { %921 = shalt.err (!%p918_p0)
}
 0x20b   : > { %s922_s8 = scalar_lea.hbm %s536_s21, 128  ;;  %s926_s0 = scalar_lea.hbm %s1307_s6, 256 }
 0x20c   : > { %p923_p3 = scmp.ne.s32.totalorder %s536_s21, %s922_s8  ;;  %p927_p7 = scmp.lt.s32.totalorder %s536_s21, %s1307_s6 }
 0x20d   : > { %p928_p4 = scmp.lt.s32.totalorder %s926_s0, %s922_s8 }
 0x20e   : > { %p924_p12 = pnand %p923_p3, %p1324_p9 }
 0x20f   : > { %p929_p6 = por %p928_p4, %p927_p7 }
 0x210   : > { %p925_p5 = pneg %p924_p12 }
 0x212   : > { %p930_p8 = pnand %p929_p6, %p925_p5 }
 0x214   : > { %933 = shalt.err (!%p930_p8)
}
 0x215   : > { %788 = dma.vmem_to_hbm [thread:$0]  (%p1324_p9), %s539_s11, 128, %s536_s21, %s525_s20  }
 0x216 PF: > { %s550_s17 = sand.u32 1, %s966_s24   ;;  %p1325_p11 = scmp.ne.s32.totalorder %s1313_s30, 0 }
 0x217   : > { %p1326_p13 = scmp.ge.s32.totalorder %s978_s27, 2  ;;  %s551_s28 = scalar_lea.sflag [#allocation7], %s550_s17 }
 0x219   : > { %p799_p10 = pnand %p1326_p13, %p1325_p11 }
 0x21b   : > { %p800_p1 = pneg %p799_p10 }
 0x21d   : > { %961 = dma.done.wait (%p800_p1), %s551_s28, 128  }
 0x21e   : > { %963 = vsyncadd (%p800_p1), %s551_s28, 4294967168  ;;  %p24_p2 = scmp.ge.s32.totalorder %s1071_s10, 4   ;;  %s1327_s24 = smov %s970_s25 }
 0x21f   : > { %s1328_s25 = smov %s974_s26  ;;  %s1329_s26 = smov %s1098_s18 }
 0x220   : > { %s1330_s27 = smov %s1071_s10  ;;  %26 = sbr.rel (!%p24_p2) target bundleno = 11 (0xb), region = 108 }
 0x225   :  { %556 = vsyncpa [#allocation6], 1 }
 0x226   :  { %558 = vsyncpa [#allocation6 + $0x1], 1 }
 0x227   :  { %559 = vsyncpa [#allocation9], 1 }
 0x228   :  { %560 = vsyncpa [#allocation7], 1 }
 0x229   :  { %562 = vsyncpa [#allocation7 + $0x1], 1 }

</bundles_post_ra>
